<compile_context>
chip_gen: v5e
topology: v5e:2x2
jax: 0.10.0
libtpu: 0.0.40
codegen_flags: <defaults>
</compile_context>

<pallas_src>
import jax
import jax.numpy as jnp
from jax.experimental import pallas as pl
from jax.experimental.pallas import tpu as pltpu

LANES = 128      # lane width (last dim of a vreg)
SUBLANES = 8     # f32 sublane count (second-to-last dim of a vreg)


def _round_up(n, m):
    return (n + m - 1) // m * m


# ----------------------------------------------------------------------------
# Kernel
# ----------------------------------------------------------------------------
def dueling_dqn_kernel(x_ref,
                       w1_ref, b1_ref, w2_ref, b2_ref,
                       wb_ref, bb_ref, wh_ref, bh_ref,
                       out_ref):
    """One batch tile of the full DuelingDQN forward (weights VMEM-resident)."""

    def linear(h, w_ref, b_ref):
        # Activations cast to the weights' dtype (bf16 by default -> native MXU
        # on v5e/v6e/v7x); accumulate in f32; bias / relu stay f32.
        h = h.astype(w_ref.dtype)
        return jnp.dot(h, w_ref[...], preferred_element_type=jnp.float32) + b_ref[...]

    h = jnp.maximum(linear(x_ref[...], w1_ref, b1_ref), 0.0)   # relu(fc1)
    h = jnp.maximum(linear(h, w2_ref, b2_ref), 0.0)            # relu(fc2)
    hh = jnp.maximum(linear(h, wb_ref, bb_ref), 0.0)           # relu(adv_fc1 | val_fc1), fused

    # Single packed head: lanes [0:A) = adv + val, lane A = adv.mean(1),
    # remaining lanes = 0.  One MXU matmul + one lane-dense store per tile.
    out_ref[...] = linear(hh, wh_ref, bh_ref)
    # TODO(synk): if large-batch profiling shows HBM-write bound, emit this
    # store in bf16 (halves writeback) and subtract in f32 in the wrapper.


# ----------------------------------------------------------------------------
# Host-side weight fusion / padding (done once, outside the per-step path)
# ----------------------------------------------------------------------------
def fuse_params(p, matmul_dtype=jnp.bfloat16):
    """Fuse branch layers + pack the mean head into the q head's padding lanes.

    All feature dims are zero-padded to 128-lane multiples so every activation
    tile and every store is lane-dense.  Exact: padded columns are relu(0) = 0
    and multiply zero weight rows downstream.
    """
    wa1, ba1, wv1, bv1 = p["wa1"], p["ba1"], p["wv1"], p["bv1"]
    wa2, ba2, wv2, bv2 = p["wa2"], p["ba2"], p["wv2"], p["bv2"]
    f1 = p["w1"].shape[1]
    f2 = p["w2"].shape[1]
    f3 = wa1.shape[1]
    A = wa2.shape[1]

    F1P = _round_up(f1, LANES)
    F2P = _round_up(f2, LANES)
    HP = _round_up(2 * f3, LANES)       # fused branch-hidden width
    AP = _round_up(A + 1, LANES)        # q lanes + 1 mean lane, lane-dense
    mean_lane = A                       # column carrying the per-row adv mean

    def pad2(w, rows, cols):
        return jnp.pad(w, ((0, rows - w.shape[0]), (0, cols - w.shape[1])))

    # Trunk.
    w1 = pad2(p["w1"], p["w1"].shape[0], F1P)
    b1 = pad2(p["b1"], 1, F1P)
    w2 = pad2(p["w2"], F1P, F2P)
    b2 = pad2(p["b2"], 1, F2P)

    # Fused first branch layer: columns [adv_fc1 | val_fc1 | zero-pad].
    wb = pad2(jnp.concatenate([wa1, wv1], axis=1), F2P, HP)
    bb = pad2(jnp.concatenate([ba1, bv1], axis=1), 1, HP)

    # Packed head.
    # adv-hidden rows: [ wa2 | mean(wa2, 1) | 0 ]   (mean(adv) by linearity)
    wh_adv = jnp.concatenate([wa2, jnp.mean(wa2, axis=1, keepdims=True)], axis=1)
    wh_adv = pad2(wh_adv, f3, AP)
    # val-hidden rows: wv2 replicated across the A q-lanes ONLY; mean lane and
    # padding lanes stay zero so the value stream does not corrupt the mean.
    wh_val = pad2(jnp.broadcast_to(wv2, (f3, A)), f3, AP)
    wh = pad2(jnp.concatenate([wh_adv, wh_val], axis=0), HP, AP)
    # bias: [ ba2 + bv2 | mean(ba2) | 0 ]  (bv2 NOT added to the mean lane)
    bh = pad2(jnp.concatenate([ba2 + bv2, jnp.mean(ba2, axis=1, keepdims=True)],
                              axis=1), 1, AP)

    dt = matmul_dtype
    return dict(w1=w1.astype(dt), b1=b1, w2=w2.astype(dt), b2=b2,
                wb=wb.astype(dt), bb=bb, wh=wh.astype(dt), bh=bh,
                mean_lane=mean_lane, action_dims=A)


# ----------------------------------------------------------------------------
# Wrapper
# ----------------------------------------------------------------------------
def dueling_dqn_forward(x, fp, action_dims, *, block_batch=1024):
    """DuelingDQN forward. `fp` comes from fuse_params(); weights stay resident.

    block_batch: batch rows per grid step.  Per-tile VMEM is tiny (KiB-scale)
    so fat tiles amortize the ~0.35 us/step pipeline overhead; the tile is
    halved if the grid would otherwise have a single step so v7x's two
    TensorCores both get work.
    """
    B, S = x.shape
    A = action_dims
    if A != B:
        # PyTorch's `val + adv - adv.mean(1)` (no keepdim) broadcasts a (B,)
        # vector against the LAST axis of (B, A): only valid when A == B.
        raise ValueError(f"action_dims ({A}) must equal batch ({B}) to match "
                         "the module's no-keepdim mean broadcast")
    AP = fp["wh"].shape[1]
    mean_lane = fp["mean_lane"]

    TB = _round_up(min(block_batch, B), SUBLANES)   # never present a (<8, x) tile
    B_pad = _round_up(B, TB)
    if B_pad // TB < 2 and B > SUBLANES:
        # Keep >= 2 grid steps so the "parallel" axis can shard the batch
        # across v7x's two TensorCores (harmless on single-TC v5e/v6e).
        TB = _round_up((B + 1) // 2, SUBLANES)
        B_pad = _round_up(B, TB)
    if B_pad != B:
        x = jnp.pad(x, ((0, B_pad - B), (0, 0)))
    # Pre-cast on the host so the in-kernel first-layer astype is free and the
    # input DMA bytes are halved on the bf16 path.
    x = x.astype(fp["w1"].dtype)

    weight_args = (fp["w1"], fp["b1"], fp["w2"], fp["b2"],
                   fp["wb"], fp["bb"], fp["wh"], fp["bh"])

    # Advisory cost estimate so XLA can schedule/overlap this small kernel.
    F1P, F2P, HP = fp["w1"].shape[1], fp["w2"].shape[1], fp["wb"].shape[1]
    flops = 2 * B_pad * (S * F1P + F1P * F2P + F2P * HP + HP * AP)
    bytes_accessed = (int(x.size) * x.dtype.itemsize
                      + sum(int(a.size) * a.dtype.itemsize for a in weight_args)
                      + B_pad * AP * 4)

    # Resident weight/bias specs use a constant index_map so they stay in VMEM
    # across the whole grid.  (pl.Buffered(1) single-buffering is unnecessary
    # at ~200 KiB of resident weights; revisit only if hidden dims scale up
    # against v7x's 64 MiB VMEM.)
    in_specs = ([pl.BlockSpec((TB, S), lambda i: (i, 0))]
                + [pl.BlockSpec(a.shape, lambda i: (0, 0)) for a in weight_args])

    out_pad = pl.pallas_call(
        dueling_dqn_kernel,
        grid=(B_pad // TB,),
        in_specs=in_specs,
        out_specs=pl.BlockSpec((TB, AP), lambda i: (i, 0)),
        out_shape=jax.ShapeDtypeStruct((B_pad, AP), jnp.float32),
        compiler_params=pltpu.CompilerParams(
            dimension_semantics=("parallel",)),   # v7x: split batch across 2 TCs
        cost_estimate=pl.CostEstimate(flops=flops, transcendentals=0,
                                      bytes_accessed=bytes_accessed),
    )(x, *weight_args)

    # PyTorch `val + adv - adv.mean(1)`: the (B,) per-row mean (carried in the
    # packed mean lane) broadcasts against the LAST axis — coupling column j to
    # global batch row j, so this one element-wise subtraction lives here.
    return out_pad[:B, :A] - out_pad[:B, mean_lane]


# ----------------------------------------------------------------------------
# Init + pure-JAX reference (PyTorch semantics, unfused weights)
# ----------------------------------------------------------------------------
def init_params(key, state_dims, fc1_dims, fc2_dims, fc3_dims, action_dims):
    """Deterministic nn.Linear-style (uniform +/- 1/sqrt(fan_in)) init."""
    def linear_init(k, fan_in, fan_out):
        kw, kb = jax.random.split(k)
        bound = 1.0 / float(fan_in) ** 0.5
        w = jax.random.uniform(kw, (fan_in, fan_out), jnp.float32, -bound, bound)
        b = jax.random.uniform(kb, (1, fan_out), jnp.float32, -bound, bound)
        return w, b

    ks = jax.random.split(key, 6)
    p = {}
    p["w1"], p["b1"] = linear_init(ks[0], state_dims, fc1_dims)
    p["w2"], p["b2"] = linear_init(ks[1], fc1_dims, fc2_dims)
    p["wa1"], p["ba1"] = linear_init(ks[2], fc2_dims, fc3_dims)
    p["wa2"], p["ba2"] = linear_init(ks[3], fc3_dims, action_dims)
    p["wv1"], p["bv1"] = linear_init(ks[4], fc2_dims, fc3_dims)
    p["wv2"], p["bv2"] = linear_init(ks[5], fc3_dims, 1)
    return p


def reference_forward(x, p):
    h = jax.nn.relu(x @ p["w1"] + p["b1"])
    h = jax.nn.relu(h @ p["w2"] + p["b2"])
    adv = jax.nn.relu(h @ p["wa1"] + p["ba1"]) @ p["wa2"] + p["ba2"]
    val = jax.nn.relu(h @ p["wv1"] + p["bv1"]) @ p["wv2"] + p["bv2"]
    return val + adv - adv.mean(axis=1)   # (B,) broadcast on last axis, A == B


if __name__ == "__main__":
    # Small shapes consistent with the module; batch == action_dims so the
    # original PyTorch broadcast `adv - adv.mean(1)` is well-defined.
    batch, state_dims = 16, 16
    fc1_dims, fc2_dims, fc3_dims = 64, 64, 32
    action_dims = 16

    key = jax.random.PRNGKey(0)
    kx, kp = jax.random.split(key)
    x = jax.random.normal(kx, (batch, state_dims), jnp.float32)
    params = init_params(kp, state_dims, fc1_dims, fc2_dims, fc3_dims, action_dims)
    ref = reference_forward(x, params)

    # Exactness check on the f32 matmul path (weight-side fusion reorders the
    # reductions slightly -> compare at 1e-4).  At this tiny demo batch the
    # wrapper splits the grid into 2 steps (TB=8) to exercise multi-tiling.
    fused_f32 = fuse_params(params, matmul_dtype=jnp.float32)
    out = jax.block_until_ready(dueling_dqn_forward(x, fused_f32, action_dims))
    assert out.shape == (batch, action_dims)
    assert jnp.allclose(out, ref, atol=1e-4, rtol=1e-4), "f32 mismatch vs JAX reference"

    # Default bf16 inference path (bf16-native MXU on v5e/v6e/v7x, f32
    # accumulation / bias / relu) — validated at a looser tolerance.
    fused_bf16 = fuse_params(params)   # matmul_dtype defaults to bfloat16
    out_bf = jax.block_until_ready(dueling_dqn_forward(x, fused_bf16, action_dims))
    assert out_bf.shape == (batch, action_dims)
    assert jnp.allclose(out_bf, ref, atol=5e-2, rtol=5e-2), "bf16 mismatch vs JAX reference"

    print("KERNEL_OK")
</pallas_src>

<mosaic_0001>
module attributes {stable_mosaic.version = 11 : i64} {
  func.func @dueling_dqn_kernel(%arg0: i32, %arg1: memref<8x16xf32, #tpu.memory_space<vmem>>, %arg2: memref<16x128xf32, #tpu.memory_space<vmem>>, %arg3: memref<1x128xf32, #tpu.memory_space<vmem>>, %arg4: memref<128x128xf32, #tpu.memory_space<vmem>>, %arg5: memref<1x128xf32, #tpu.memory_space<vmem>>, %arg6: memref<128x128xf32, #tpu.memory_space<vmem>>, %arg7: memref<1x128xf32, #tpu.memory_space<vmem>>, %arg8: memref<128x128xf32, #tpu.memory_space<vmem>>, %arg9: memref<1x128xf32, #tpu.memory_space<vmem>>, %arg10: memref<8x128xf32, #tpu.memory_space<vmem>>) attributes {dimension_semantics = [#tpu.dimension_semantics<parallel>], iteration_bounds = array<i64: 2>, scalar_prefetch = 0 : i64, scratch_operands = 0 : i64, tpu.core_type = #tpu.core_type<tc>, window_params = [{transform_indices = @transform_0, window_bounds = array<i64: 8, 16>}, {pipeline_mode = #tpu.pipeline_mode<synchronous>, transform_indices = @transform_1, window_bounds = array<i64: 16, 128>}, {pipeline_mode = #tpu.pipeline_mode<synchronous>, transform_indices = @transform_2, window_bounds = array<i64: 1, 128>}, {pipeline_mode = #tpu.pipeline_mode<synchronous>, transform_indices = @transform_3, window_bounds = array<i64: 128, 128>}, {pipeline_mode = #tpu.pipeline_mode<synchronous>, transform_indices = @transform_4, window_bounds = array<i64: 1, 128>}, {pipeline_mode = #tpu.pipeline_mode<synchronous>, transform_indices = @transform_5, window_bounds = array<i64: 128, 128>}, {pipeline_mode = #tpu.pipeline_mode<synchronous>, transform_indices = @transform_6, window_bounds = array<i64: 1, 128>}, {pipeline_mode = #tpu.pipeline_mode<synchronous>, transform_indices = @transform_7, window_bounds = array<i64: 128, 128>}, {pipeline_mode = #tpu.pipeline_mode<synchronous>, transform_indices = @transform_8, window_bounds = array<i64: 1, 128>}, {transform_indices = @transform_9, window_bounds = array<i64: 8, 128>}]} {
    %c0 = arith.constant 0 : index
    %c0_0 = arith.constant 0 : index
    %0 = vector.load %arg1[%c0, %c0_0] : memref<8x16xf32, #tpu.memory_space<vmem>>, vector<8x16xf32>
    %c0_1 = arith.constant 0 : index
    %c0_2 = arith.constant 0 : index
    %1 = vector.load %arg2[%c0_1, %c0_2] : memref<16x128xf32, #tpu.memory_space<vmem>>, vector<16x128xf32>
    %cst = arith.constant dense<0.000000e+00> : vector<8x128xf32>
    %2 = tpu.matmul %0, %1, %cst {dimension_numbers = #tpu.dot_dimension_numbers<[1], [0], [0], [1], [0, 0, 1, 1], [], []>} : vector<8x16xf32>, vector<16x128xf32>, vector<8x128xf32> -> vector<8x128xf32>
    %c0_3 = arith.constant 0 : index
    %c0_4 = arith.constant 0 : index
    %3 = vector.load %arg3[%c0_3, %c0_4] : memref<1x128xf32, #tpu.memory_space<vmem>>, vector<1x128xf32>
    %4 = vector.broadcast %3 : vector<1x128xf32> to vector<8x128xf32>
    %5 = arith.addf %2, %4 : vector<8x128xf32>
    %cst_5 = arith.constant 0.000000e+00 : f32
    %6 = vector.broadcast %cst_5 : f32 to vector<8x128xf32>
    %7 = arith.maximumf %5, %6 : vector<8x128xf32>
    %c0_6 = arith.constant 0 : index
    %c0_7 = arith.constant 0 : index
    %8 = vector.load %arg4[%c0_6, %c0_7] : memref<128x128xf32, #tpu.memory_space<vmem>>, vector<128x128xf32>
    %cst_8 = arith.constant dense<0.000000e+00> : vector<8x128xf32>
    %9 = tpu.matmul %7, %8, %cst_8 {dimension_numbers = #tpu.dot_dimension_numbers<[1], [0], [0], [1], [0, 0, 1, 1], [], []>} : vector<8x128xf32>, vector<128x128xf32>, vector<8x128xf32> -> vector<8x128xf32>
    %c0_9 = arith.constant 0 : index
    %c0_10 = arith.constant 0 : index
    %10 = vector.load %arg5[%c0_9, %c0_10] : memref<1x128xf32, #tpu.memory_space<vmem>>, vector<1x128xf32>
    %11 = vector.broadcast %10 : vector<1x128xf32> to vector<8x128xf32>
    %12 = arith.addf %9, %11 : vector<8x128xf32>
    %cst_11 = arith.constant 0.000000e+00 : f32
    %13 = vector.broadcast %cst_11 : f32 to vector<8x128xf32>
    %14 = arith.maximumf %12, %13 : vector<8x128xf32>
    %c0_12 = arith.constant 0 : index
    %c0_13 = arith.constant 0 : index
    %15 = vector.load %arg6[%c0_12, %c0_13] : memref<128x128xf32, #tpu.memory_space<vmem>>, vector<128x128xf32>
    %cst_14 = arith.constant dense<0.000000e+00> : vector<8x128xf32>
    %16 = tpu.matmul %14, %15, %cst_14 {dimension_numbers = #tpu.dot_dimension_numbers<[1], [0], [0], [1], [0, 0, 1, 1], [], []>} : vector<8x128xf32>, vector<128x128xf32>, vector<8x128xf32> -> vector<8x128xf32>
    %c0_15 = arith.constant 0 : index
    %c0_16 = arith.constant 0 : index
    %17 = vector.load %arg7[%c0_15, %c0_16] : memref<1x128xf32, #tpu.memory_space<vmem>>, vector<1x128xf32>
    %18 = vector.broadcast %17 : vector<1x128xf32> to vector<8x128xf32>
    %19 = arith.addf %16, %18 : vector<8x128xf32>
    %cst_17 = arith.constant 0.000000e+00 : f32
    %20 = vector.broadcast %cst_17 : f32 to vector<8x128xf32>
    %21 = arith.maximumf %19, %20 : vector<8x128xf32>
    %c0_18 = arith.constant 0 : index
    %c0_19 = arith.constant 0 : index
    %22 = vector.load %arg8[%c0_18, %c0_19] : memref<128x128xf32, #tpu.memory_space<vmem>>, vector<128x128xf32>
    %cst_20 = arith.constant dense<0.000000e+00> : vector<8x128xf32>
    %23 = tpu.matmul %21, %22, %cst_20 {dimension_numbers = #tpu.dot_dimension_numbers<[1], [0], [0], [1], [0, 0, 1, 1], [], []>} : vector<8x128xf32>, vector<128x128xf32>, vector<8x128xf32> -> vector<8x128xf32>
    %c0_21 = arith.constant 0 : index
    %c0_22 = arith.constant 0 : index
    %24 = vector.load %arg9[%c0_21, %c0_22] : memref<1x128xf32, #tpu.memory_space<vmem>>, vector<1x128xf32>
    %25 = vector.broadcast %24 : vector<1x128xf32> to vector<8x128xf32>
    %26 = arith.addf %23, %25 : vector<8x128xf32>
    %c0_23 = arith.constant 0 : index
    %c0_24 = arith.constant 0 : index
    %27 = vector.load %arg10[%c0_23, %c0_24] : memref<8x128xf32, #tpu.memory_space<vmem>>, vector<8x128xf32>
    tpu.vector_store %arg10[%c0_23, %c0_24], %26 {strides = array<i32>} : memref<8x128xf32, #tpu.memory_space<vmem>>, vector<8x128xf32>,
    return
  }
  func.func @transform_0(%arg0: i32) -> (i32, i32) {
    %c0_i32 = arith.constant 0 : i32
    %c0_i32_0 = arith.constant 0 : i32
    return %arg0, %c0_i32 : i32, i32
  }
  func.func @transform_1(%arg0: i32) -> (i32, i32) {
    %c0_i32 = arith.constant 0 : i32
    %c0_i32_0 = arith.constant 0 : i32
    %c0_i32_1 = arith.constant 0 : i32
    return %c0_i32, %c0_i32_0 : i32, i32
  }
  func.func @transform_2(%arg0: i32) -> (i32, i32) {
    %c0_i32 = arith.constant 0 : i32
    %c0_i32_0 = arith.constant 0 : i32
    %c0_i32_1 = arith.constant 0 : i32
    return %c0_i32, %c0_i32_0 : i32, i32
  }
  func.func @transform_3(%arg0: i32) -> (i32, i32) {
    %c0_i32 = arith.constant 0 : i32
    %c0_i32_0 = arith.constant 0 : i32
    %c0_i32_1 = arith.constant 0 : i32
    return %c0_i32, %c0_i32_0 : i32, i32
  }
  func.func @transform_4(%arg0: i32) -> (i32, i32) {
    %c0_i32 = arith.constant 0 : i32
    %c0_i32_0 = arith.constant 0 : i32
    %c0_i32_1 = arith.constant 0 : i32
    return %c0_i32, %c0_i32_0 : i32, i32
  }
  func.func @transform_5(%arg0: i32) -> (i32, i32) {
    %c0_i32 = arith.constant 0 : i32
    %c0_i32_0 = arith.constant 0 : i32
    %c0_i32_1 = arith.constant 0 : i32
    return %c0_i32, %c0_i32_0 : i32, i32
  }
  func.func @transform_6(%arg0: i32) -> (i32, i32) {
    %c0_i32 = arith.constant 0 : i32
    %c0_i32_0 = arith.constant 0 : i32
    %c0_i32_1 = arith.constant 0 : i32
    return %c0_i32, %c0_i32_0 : i32, i32
  }
  func.func @transform_7(%arg0: i32) -> (i32, i32) {
    %c0_i32 = arith.constant 0 : i32
    %c0_i32_0 = arith.constant 0 : i32
    %c0_i32_1 = arith.constant 0 : i32
    return %c0_i32, %c0_i32_0 : i32, i32
  }
  func.func @transform_8(%arg0: i32) -> (i32, i32) {
    %c0_i32 = arith.constant 0 : i32
    %c0_i32_0 = arith.constant 0 : i32
    %c0_i32_1 = arith.constant 0 : i32
    return %c0_i32, %c0_i32_0 : i32, i32
  }
  func.func @transform_9(%arg0: i32) -> (i32, i32) {
    %c0_i32 = arith.constant 0 : i32
    %c0_i32_0 = arith.constant 0 : i32
    return %arg0, %c0_i32 : i32, i32
  }
}

</mosaic_0001>

<bundles_post_ra>
// kernel: tpu_custom_call.1
= control target key start
LH: loop header
LB: loop body
LE: loop exit
PB: predicated region body
PF: predicated region fallthrough
CT: control target
= control target key end

     0   :  { %s1274_s0 = inlined_call_operand.hbm [shape: f32[16,16], index: 0, kind: input, shape index: {}]   ;;  %s1275_s1 = inlined_call_operand.hbm [shape: f32[16,128], index: 1, kind: input, shape index: {}]   ;;  %s1276_s2 = inlined_call_operand.vmem [shape: f32[1,128], index: 2, kind: input, shape index: {}]   ;;  %s1277_s3 = inlined_call_operand.hbm [shape: f32[128,128], index: 3, kind: input, shape index: {}]   ;;  %s1278_s4 = inlined_call_operand.vmem [shape: f32[1,128], index: 4, kind: input, shape index: {}]   ;;  %s1279_s5 = inlined_call_operand.hbm [shape: f32[128,128], index: 5, kind: input, shape index: {}]   ;;  %s1280_s6 = inlined_call_operand.vmem [shape: f32[1,128], index: 6, kind: input, shape index: {}]   ;;  %s1281_s7 = inlined_call_operand.hbm [shape: f32[128,128], index: 7, kind: input, shape index: {}]   ;;  %s1282_s8 = inlined_call_operand.vmem [shape: f32[1,128], index: 8, kind: input, shape index: {}]   ;;  %s1283_s9 = inlined_call_operand.hbm [shape: f32[16,128], index: 9, kind: output, shape index: {}]  }
   0x1   :  { %1284 = sst [smem:[#allocation16_spill]] %s1275_s1 }
   0x2   :  { %1285 = sst [smem:[#allocation17_spill]] %s1277_s3 }
   0x3   :  { %1286 = sst [smem:[#allocation18_spill]] %s1279_s5 }
   0x4   :  { %1287 = sst [smem:[#allocation19_spill]] %s1281_s7 }
   0x5   :  { %14 = vsyncpa [#allocation3], 0 }
   0x6   :  { %16 = vsyncpa [#allocation3 + $0x1], 0 }
   0x7   :  { %17 = vsyncpa [#allocation6], 0 }
   0x8   :  { %18 = vsyncpa [#allocation9], 0 }
   0x9   :  { %19 = vsyncpa [#allocation4], 0 }
   0xa   :  { %21 = vsyncpa [#allocation4 + $0x1], 0  ;;  %s1091_s30 = smov 0   ;;  %s1093_s10 = smov 0  }
   0xb   :  { %s1095_s11 = smov 0   ;;  %s1097_s12 = smov 0  }
   0xc LB: > { %s1288_s1 = sld [smem:[#allocation16_spill]]  ;;  %s1115_s16 = sadd.s32 4294967295, %s1033_s12   ;;  %s1033_s12 = sphi %s1097_s12, %s1303_s12   ;;  %s1029_s11 = sphi %s1095_s11, %s1302_s11   ;;  %s1025_s10 = sphi %s1093_s10, %s1301_s10   ;;  %s1021_s30 = sphi %s1091_s30, %s1300_s30  }
   0xd   : > { %p696_p0 = scmp.ge.s32.totalorder %s1033_s12, 1  ;;  %p48_p1 = scmp.eq.s32.totalorder %s1115_s16, 0 }
   0xe   : > { %p252_p2 = scmp.lt.s32.totalorder %s1033_s12, 3  ;;  %s1035_s18 = smov [#allocation5]  }
   0xf   : > { %s265_s19 = sshll.u32 %s1035_s18, 4  ;;  %s1290_s5 = sld [smem:[#allocation18_spill]]  ;;  %s266_s19 = int_to_ptr.vmem [resolvable:$true] %s265_s19 }
  0x10   : > { %p1120_p3 = pnand %p696_p0, %p252_p2  ;;  %s1292_s3 = sld [smem:[#allocation17_spill]] }
  0x11   : > { %s1036_s27 = smov [#allocation8]   ;;  %s1037_s29 = smov 128  }
  0x12   : > { %s263_s15 = sshll.u32 %s1288_s1, 4  ;;  %p736_p4 = pneg %p1120_p3  ;;  %s264_s15 = int_to_ptr.hbm [resolvable:$true] %s263_s15 }
  0x13   : > { %s299_s28 = sshll.u32 %s1036_s27, 4  ;;  %s1038_s13 = smov 8   ;;  %s300_s28 = int_to_ptr.vmem [resolvable:$true] %s299_s28 }
  0x14   : > { %p1132_p6 = pnand %p736_p4, %p48_p1  ;;  %s1293_s7 = sld [smem:[#allocation19_spill]] }
  0x15   : > { %s297_s22 = sshll.u32 %s1290_s5, 4  ;;  %s1039_s21 = smov [#allocation7]   ;;  %s298_s22 = int_to_ptr.hbm [resolvable:$true] %s297_s22 }
  0x16   : > { %s280_s26 = sshll.u32 %s1292_s3, 4  ;;  %s282_s24 = sshll.u32 %s1039_s21, 4  ;;  %s281_s26 = int_to_ptr.hbm [resolvable:$true] %s280_s26  ;;  %s283_s24 = int_to_ptr.vmem [resolvable:$true] %s282_s24 }
  0x17   : > { %739 = dma.hbm_to_vmem [thread:$0]  (!%p1132_p6), %s264_s15, 256, %s266_s19, [#allocation6], %s1037_s29, %s1037_s29, %s1038_s13  }
  0x18   : > { %745 = dma.hbm_to_vmem [thread:$0]  (!%p1132_p6), %s298_s22, 2048, %s300_s28, [#allocation9], %s1037_s29, %s1037_s29, %s1038_s13  }
  0x19   : > { %742 = dma.hbm_to_vmem [thread:$0]  (!%p1132_p6), %s281_s26, 2048, %s283_s24, [#allocation6], %s1037_s29, %s1037_s29, %s1038_s13  }
  0x1a   : > { %s314_s20 = sshll.u32 %s1293_s7, 4  ;;  %s1040_s15 = smov [#allocation10]   ;;  %s315_s20 = int_to_ptr.hbm [resolvable:$true] %s314_s20 }
  0x1b   : > { %s316_s19 = sshll.u32 %s1040_s15, 4  ;;  %s695_s22 = sadd.s32 4294967294, %s1033_s12   ;;  %s317_s19 = int_to_ptr.vmem [resolvable:$true] %s316_s19 }
  0x1c   : > { %748 = dma.hbm_to_vmem [thread:$0]  (!%p1132_p6), %s315_s20, 2048, %s317_s19, [#allocation9], %s1037_s29, %s1037_s29, %s1038_s13  }
  0x1d   : > { %s1152_s25 = sadd.s32 1, %s1033_s12   ;;  %s34_s28 = sadd.s32 1, %s1029_s11 }
  0x1e   : > { %s31_s27 = ssub.s32 %s1033_s12, %s1152_s25  ;;  %p41_p8 = scmp.ne.s32.totalorder %s1029_s11, %s1025_s10 }
  0x1f   : > { %p32_p7 = scmp.eq.s32.totalorder %s31_s27, 0  ;;  %p42_p9 = scmp.eq.s32.totalorder %s1033_s12, 0 }
  0x20   : > { %p47_p10 = scmp.ne.s32.totalorder %s1025_s10, %s1021_s30  ;;  %p239_p13 = scmp.eq.s32.totalorder %s1115_s16, 1 }
  0x21   : > { %s1163_s26 = scalar_select %p32_p7, %s1029_s11, %s34_s28  }
  0x22   : > { %p1165_p11 = por %p42_p9, %p41_p8  ;;  %p1171_p12 = por %p48_p1, %p47_p10 }
  0x23   : > { %p245_p0 = scmp.eq.s32.totalorder %s695_s22, 1  ;;  %p761_p2 = scmp.lt.s32.totalorder %s1033_s12, 2 }
  0x24   : > { %s333_s29 = sand.u32 1, %s1029_s11   ;;  %p1178_p4 = por %p239_p13, %p41_p8 }
  0x25   : > { %p1182_p6 = por %p245_p0, %p47_p10  ;;  %s702_s20 = sshll.u32 %s333_s29, 3 }
  0x26   : > { %s703_s21 = sshll.u32 %s1033_s12, 3  ;;  %s337_s27 = scalar_lea.vmem [#allocation2], %s702_s20 }
  0x27   : > { %s341_s19 = scalar_lea.hbm %s1274_s0, %s703_s21  ;;  %s345_s28 = sshll.u32 %s337_s27, 4  ;;  %s346_s28 = int_to_ptr.vmem [resolvable:$true] %s345_s28 }
  0x28   : > { %s343_s1 = sshll.u32 %s341_s19, 4  ;;  %p1192_p7 = pnand %p761_p2, %p1165_p11  ;;  %s344_s1 = int_to_ptr.hbm [resolvable:$true] %s343_s1 }
  0x29   : > { %s334_s3 = scalar_lea.sflag [#allocation3], %s333_s29  ;;  %s929_s5 = sshra.s32 %s344_s1, 4  ;;  %s930_s5 = int_to_ptr.hbm [resolvable:$true] %s929_s5 }
  0x2a   : > { %s931_s7 = scalar_lea.hbm %s930_s5, 8  ;;  %p933_p9 = pneg %p1192_p7 }
  0x2b   : > { %p932_p8 = scmp.ne.s32.totalorder %s930_s5, %s931_s7  ;;  %s936_s24 = scalar_lea.hbm %s1274_s0, 16 }
  0x2c   : > { %p937_p11 = scmp.lt.s32.totalorder %s930_s5, %s1274_s0  ;;  %p938_p0 = scmp.lt.s32.totalorder %s936_s24, %s931_s7 }
  0x2d   : > { %p934_p10 = pnand %p933_p9, %p932_p8 }
  0x2e   : > { %p939_p2 = por %p938_p0, %p937_p11 }
  0x2f   : > { %p935_p13 = pneg %p934_p10 }
  0x31   : > { %p940_p5 = pnand %p939_p2, %p935_p13 }
  0x33   : > { %943 = shalt.err (!%p940_p5)
}
  0x34   : > { %752 = dma.hbm_to_vmem [thread:$0]  (!%p1192_p7), %s344_s1, 128, %s346_s28, %s334_s3  }
  0x35   : > { %354 = sbr.rel (%p1120_p3) target bundleno = 600 (0x258), region = 56  ;;  %s1209_s29 = sand.u32 (!%p1120_p3), 1, %s1025_s10  }
  0x36   : > { %s705_s19 = sshll.u32 (!%p1120_p3), %s1209_s29, 3  ;;  %s357_s27 = scalar_lea.sflag (!%p1120_p3), [#allocation3], %s1209_s29 }
  0x37   : > { %s360_s5 = scalar_lea.vmem (!%p1120_p3), [#allocation2], %s705_s19 }
  0x3a   : > { %1004 = dma.done.wait (%p1171_p12), %s357_s27, 128  }
  0x3b   : > { %1006 = vsyncadd (%p1171_p12), %s357_s27, 4294967168 }
  0x3c   : > { %1008 = dma.done.wait (%p48_p1), [#allocation6], 2304  }
  0x3d   : > { %1010 = vsyncadd (%p48_p1), [#allocation6], 4294964992 }
  0x3e   : > { %1012 = dma.done.wait (%p48_p1), [#allocation9], 4096  }
  0x3f   : > { %1014 = vsyncadd (%p48_p1), [#allocation9], 4294963200  ;;  %v418_v0 = vld [vmem:[#allocation5 + $0x8] sm:$0xff]  ;;  %v417_v1 = vld [vmem:[#allocation5] sm:$0xff]  ;;  %vm423_vm0 = vcmask 130048   ;;  %s713_s22 = sshll.u32 %s1115_s16, 3 }
  0x40   : > { %441 = vmatpush.msra.mxu0 %v418_v0  ;;  %v416_v2 = vld [vmem:[%s360_s5] sm:$0xff]  ;;  %v463_v3 = vld [vmem:[#allocation7 + $0x78] sm:$0xff]  ;;  %v462_v4 = vld [vmem:[#allocation7 + $0x70] sm:$0xff]  ;;  %s582_s24 = scalar_lea.hbm %s1283_s9, %s713_s22  ;;  %s415_s27 = scalar_lea.vmem [#allocation11], %s705_s19 }
  0x41   : > { %468 = vmatpush.msra.mxu1 %v463_v3  ;;  %v461_v5 = vld [vmem:[#allocation7 + $0x68] sm:$0xff]  ;;  %v460_v6 = vld [vmem:[#allocation7 + $0x60] sm:$0xff]  ;;  %v459_v7 = vld [vmem:[#allocation7 + $0x58] sm:$0xff]  ;;  %s584_s5 = sshll.u32 %s415_s27, 4  ;;  %s586_s1 = sshll.u32 %s582_s24, 4  ;;  %s585_s5 = int_to_ptr.vmem [resolvable:$true] %s584_s5  ;;  %s587_s1 = int_to_ptr.hbm [resolvable:$true] %s586_s1 }
  0x42   : > { %442 = vmatpush.msra.mxu0 %v417_v1  ;;  %v458_v8 = vld [vmem:[#allocation7 + $0x50] sm:$0xff]  ;;  %v457_v9 = vld [vmem:[#allocation7 + $0x48] sm:$0xff]  ;;  %v456_v10 = vld [vmem:[#allocation7 + $0x40] sm:$0xff]  ;;  %s572_s3 = scalar_lea.sflag [#allocation4], %s1209_s29  ;;  %s973_s16 = sshra.s32 %s587_s1, 4  ;;  %s974_s16 = int_to_ptr.hbm [resolvable:$true] %s973_s16 }
  0x43   : > { %711 = vmatmul.msk.f32.vlgmr.msra.gmra.mxu0 %vm423_vm0, %v416_v2  ;;  %469 = vmatpush.msra.mxu1 %v462_v4  ;;  %v455_v11 = vld [vmem:[#allocation7 + $0x38] sm:$0xff]  ;;  %v454_v12 = vld [vmem:[#allocation7 + $0x30] sm:$0xff]  ;;  %v453_v13 = vld [vmem:[#allocation7 + $0x28] sm:$0xff]  ;;  %s975_s7 = scalar_lea.hbm %s974_s16, 8  ;;  %s979_s28 = scalar_lea.hbm %s1283_s9, 16 }
  0x44   : > { %v452_v14 = vld [vmem:[#allocation7 + $0x20] sm:$0xff]  ;;  %v451_v15 = vld [vmem:[#allocation7 + $0x18] sm:$0xff]  ;;  %v450_v16 = vld [vmem:[#allocation7 + $0x10] sm:$0xff]  ;;  %p976_p1 = scmp.ne.s32.totalorder %s974_s16, %s975_s7  ;;  %p980_p12 = scmp.lt.s32.totalorder %s974_s16, %s1283_s9 }
  0x45   : > { %470 = vmatpush.msra.mxu1 %v461_v5  ;;  %v449_v17 = vld [vmem:[#allocation7 + $0x8] sm:$0xff]  ;;  %v448_v18 = vld [vmem:[#allocation7] sm:$0xff]  ;;  %v504_v19 = vld [vmem:[#allocation8 + $0x78] sm:$0xff]  ;;  %p981_p7 = scmp.lt.s32.totalorder %s979_s28, %s975_s7 }
  0x46   : > { %v503_v20 = vld [vmem:[#allocation8 + $0x70] sm:$0xff]  ;;  %509 = vmatpush.msra.mxu2 %v504_v19  ;;  %v502_v21 = vld [vmem:[#allocation8 + $0x68] sm:$0xff]  ;;  %v501_v22 = vld [vmem:[#allocation8 + $0x60] sm:$0xff]  ;;  %p977_p3 = pnand %p976_p1, %p1178_p4 }
  0x47   : > { %471 = vmatpush.msra.mxu1 %v460_v6  ;;  %v500_v23 = vld [vmem:[#allocation8 + $0x58] sm:$0xff]  ;;  %v499_v24 = vld [vmem:[#allocation8 + $0x50] sm:$0xff]  ;;  %v498_v25 = vld [vmem:[#allocation8 + $0x48] sm:$0xff]  ;;  %p982_p8 = por %p981_p7, %p980_p12 }
  0x48   : > { %510 = vmatpush.msra.mxu2 %v503_v20  ;;  %v497_v26 = vld [vmem:[#allocation8 + $0x40] sm:$0xff]  ;;  %v496_v27 = vld [vmem:[#allocation8 + $0x38] sm:$0xff]  ;;  %v495_v28 = vld [vmem:[#allocation8 + $0x30] sm:$0xff]  ;;  %p978_p5 = pneg %p977_p3 }
  0x49   : > { %472 = vmatpush.msra.mxu1 %v459_v7  ;;  %v494_v29 = vld [vmem:[#allocation8 + $0x28] sm:$0xff]  ;;  %v493_v30 = vld [vmem:[#allocation8 + $0x20] sm:$0xff]  ;;  %v492_v31 = vld [vmem:[#allocation8 + $0x18] sm:$0xff] }
  0x4a   : > { %511 = vmatpush.msra.mxu2 %v502_v21  ;;  %v805_v32 = vld [vmem:[%s1276_s2] ss:$0 sm:$0xff]  ;;  %v491_v36 = vld [vmem:[#allocation8 + $0x10] sm:$0xff]  ;;  %v490_v37 = vld [vmem:[#allocation8 + $0x8] sm:$0xff]  ;;  %p983_p9 = pnand %p982_p8, %p978_p5 }
  0x4b   : > { %473 = vmatpush.msra.mxu1 %v458_v8  ;;  %v489_v38 = vld [vmem:[#allocation8] sm:$0xff]  ;;  %v545_v39 = vld [vmem:[#allocation10 + $0x78] sm:$0xff]  ;;  %v544_v40 = vld [vmem:[#allocation10 + $0x70] sm:$0xff] }
  0x4c   : > { %512 = vmatpush.msra.mxu2 %v501_v22  ;;  %550 = vmatpush.msra.mxu3 %v545_v39  ;;  %v543_v41 = vld [vmem:[#allocation10 + $0x68] sm:$0xff]  ;;  %v542_v42 = vld [vmem:[#allocation10 + $0x60] sm:$0xff]  ;;  %v541_v43 = vld [vmem:[#allocation10 + $0x58] sm:$0xff] }
  0x4d   : > { %474 = vmatpush.msra.mxu1 %v457_v9  ;;  %v540_v44 = vld [vmem:[#allocation10 + $0x50] sm:$0xff]  ;;  %v539_v45 = vld [vmem:[#allocation10 + $0x48] sm:$0xff]  ;;  %v538_v46 = vld [vmem:[#allocation10 + $0x40] sm:$0xff] }
  0x4e   : > { %513 = vmatpush.msra.mxu2 %v500_v23  ;;  %551 = vmatpush.msra.mxu3 %v544_v40  ;;  %v537_v47 = vld [vmem:[#allocation10 + $0x38] sm:$0xff]  ;;  %v536_v48 = vld [vmem:[#allocation10 + $0x30] sm:$0xff]  ;;  %v535_v49 = vld [vmem:[#allocation10 + $0x28] sm:$0xff] }
  0x4f   : > { %475 = vmatpush.msra.mxu1 %v456_v10  ;;  %v534_v50 = vld [vmem:[#allocation10 + $0x20] sm:$0xff]  ;;  %v533_v51 = vld [vmem:[#allocation10 + $0x18] sm:$0xff]  ;;  %v532_v56 = vld [vmem:[#allocation10 + $0x10] sm:$0xff] }
  0x50   : > { %514 = vmatpush.msra.mxu2 %v499_v24  ;;  %552 = vmatpush.msra.mxu3 %v543_v41  ;;  %v806_v52 = vld [vmem:[%s1278_s4] ss:$0 sm:$0xff]  ;;  %v531_v57 = vld [vmem:[#allocation10 + $0x8] sm:$0xff] }
  0x51   : > { %476 = vmatpush.msra.mxu1 %v455_v11  ;;  %v530_v58 = vld [vmem:[#allocation10] sm:$0xff] }
  0x52   : > { %515 = vmatpush.msra.mxu2 %v498_v25  ;;  %553 = vmatpush.msra.mxu3 %v542_v42  ;;  %v807_v59 = vld [vmem:[%s1280_s6] ss:$0 sm:$0xff] }
  0x53   : > { %477 = vmatpush.msra.mxu1 %v454_v12  ;;  %v808_v63 = vld [vmem:[%s1282_s8] ss:$0 sm:$0xff] }
  0x54   : > { %516 = vmatpush.msra.mxu2 %v497_v26  ;;  %554 = vmatpush.msra.mxu3 %v541_v43 }
  0x55   : > { %478 = vmatpush.msra.mxu1 %v453_v13 }
  0x56   : > { %517 = vmatpush.msra.mxu2 %v496_v27  ;;  %555 = vmatpush.msra.mxu3 %v540_v44 }
  0x57   : > { %479 = vmatpush.msra.mxu1 %v452_v14 }
  0x58   : > { %518 = vmatpush.msra.mxu2 %v495_v28  ;;  %556 = vmatpush.msra.mxu3 %v539_v45 }
  0x59   : > { %480 = vmatpush.msra.mxu1 %v451_v15 }
  0x5a   : > { %519 = vmatpush.msra.mxu2 %v494_v29  ;;  %557 = vmatpush.msra.mxu3 %v538_v46 }
  0x5b   : > { %481 = vmatpush.msra.mxu1 %v450_v16 }
  0x5c   : > { %520 = vmatpush.msra.mxu2 %v493_v30  ;;  %558 = vmatpush.msra.mxu3 %v537_v47 }
  0x5d   : > { %482 = vmatpush.msra.mxu1 %v449_v17 }
  0x5e   : > { %521 = vmatpush.msra.mxu2 %v492_v31  ;;  %559 = vmatpush.msra.mxu3 %v536_v48 }
  0x5f   : > { %483 = vmatpush.msra.mxu1 %v448_v18 }
  0x60   : > { %522 = vmatpush.msra.mxu2 %v491_v36  ;;  %560 = vmatpush.msra.mxu3 %v535_v49 }
  0x62   : > { %523 = vmatpush.msra.mxu2 %v490_v37  ;;  %561 = vmatpush.msra.mxu3 %v534_v50 }
  0x64   : > { %524 = vmatpush.msra.mxu2 %v489_v38  ;;  %562 = vmatpush.msra.mxu3 %v533_v51 }
  0x66   : > { %563 = vmatpush.msra.mxu3 %v532_v56 }
  0x68   : > { %564 = vmatpush.msra.mxu3 %v531_v57 }
  0x6a   : > { %565 = vmatpush.msra.mxu3 %v530_v58 }
  0xc0   : > { %v444_v33 = vpop.f32.mrf.mxu0 }
  0xc1   : > { %v445_v34 = vadd.f32 %v805_v32, %v444_v33 }
  0xc3   : > { %v447_v35 = vmax.f32 %v445_v34, 0.0 }
  0xc5   : > { %484 = vmatmul.f32.vlgmr.msra.gmra.mxu1 %v447_v35 }
 0x142   : > { %v485_v53 = vpop.f32.mrf.mxu1 }
 0x143   : > { %v486_v54 = vadd.f32 %v806_v52, %v485_v53 }
 0x145   : > { %v488_v55 = vmax.f32 %v486_v54, 0.0 }
 0x147   : > { %525 = vmatmul.f32.vlgmr.msra.gmra.mxu2 %v488_v55 }
 0x1ca   : > { %v526_v60 = vpop.f32.mrf.mxu2 }
 0x1cb   : > { %v527_v61 = vadd.f32 %v807_v59, %v526_v60 }
 0x1cd   : > { %v529_v62 = vmax.f32 %v527_v61, 0.0 }
 0x1cf   : > { %566 = vmatmul.f32.vlgmr.msra.gmra.mxu3 %v529_v62 }
 0x252   : > { %v567_v0 = vpop.f32.mrf.mxu3 }
 0x253   : > { %v568_v1 = vadd.f32 %v808_v63, %v567_v0 }
 0x255   : > { %570 = vst [vmem:[%s415_s27] sm:$0xff] %v568_v1 }
 0x256   : > { %986 = shalt.err (!%p983_p9)
}
 0x257   : > { %734 = dma.vmem_to_hbm [thread:$0]  (%p1178_p4), %s585_s5, 128, %s587_s1, %s572_s3  }
 0x258 PF: > { %s598_s29 = sand.u32 1, %s1021_s30   ;;  %p1299_p10 = scmp.ge.s32.totalorder %s1033_s12, 2 }
 0x259   : > { %s599_s20 = scalar_lea.sflag [#allocation4], %s598_s29 }
 0x25a   : > { %p754_p13 = pnand %p1299_p10, %p1182_p6 }
 0x25c   : > { %p755_p11 = pneg %p754_p13 }
 0x25e   : > { %1016 = dma.done.wait (%p755_p11), %s599_s20, 128  }
 0x25f   : > { %1018 = vsyncadd (%p755_p11), %s599_s20, 4294967168  ;;  %p24_p0 = scmp.ge.s32.totalorder %s1152_s25, 4   ;;  %s1300_s30 = smov %s1025_s10 }
 0x260   : > { %s1301_s10 = smov %s1029_s11  ;;  %s1302_s11 = smov %s1163_s26 }
 0x261   : > { %s1303_s12 = smov %s1152_s25  ;;  %26 = sbr.rel (!%p24_p0) target bundleno = 12 (0xc), region = 117 }
 0x266   :  { %605 = vsyncpa [#allocation3], 1 }
 0x267   :  { %607 = vsyncpa [#allocation3 + $0x1], 1 }
 0x268   :  { %608 = vsyncpa [#allocation6], 1 }
 0x269   :  { %609 = vsyncpa [#allocation9], 1 }
 0x26a   :  { %610 = vsyncpa [#allocation4], 1 }
 0x26b   :  { %612 = vsyncpa [#allocation4 + $0x1], 1 }

</bundles_post_ra>
